<compile_context>
chip_gen: v5e
topology: v5e:2x2
jax: 0.10.0
libtpu: 0.0.40
codegen_flags: <defaults>
</compile_context>

<pallas_src>
import jax
import jax.numpy as jnp
from jax.experimental import pallas as pl
from jax.experimental.pallas import tpu as pltpu


def _make_fuser_kernel(*, H, Qc, E, T, A, Hpad):
    """Build the single-invocation fused attention kernel (all heads at once)."""
    TA = T * A
    HQc = H * Qc
    HE = H * E
    scale = float(Qc) ** -0.5
    f32, bf16 = jnp.float32, jnp.bfloat16

    def kernel(x_ref, wqkv_ref, wf_ref, bf_ref, out_ref):
        # ---- fused block-diagonal q/k/v projection, bias via ones-row: 1 MXU push
        qkv = jnp.dot(wqkv_ref[...], x_ref[...],
                      preferred_element_type=f32)            # (2*HQc + HE, TA) f32
        q = qkv[:HQc]                                         # (HQc, TA)  q tiled over T
        k = qkv[HQc:2 * HQc]                                  # (HQc, TA)
        v = qkv[2 * HQc:].astype(bf16)                        # (HE,  TA)  bf16 (vreg relief)

        # ---- per-head sum over Qc via an in-kernel block-diagonal selector: 1 push
        r = jax.lax.broadcasted_iota(jnp.int32, (H, HQc), 1)
        h = jax.lax.broadcasted_iota(jnp.int32, (H, HQc), 0)
        ssum = jnp.where((r >= h * Qc) & (r < h * Qc + Qc), 1.0, 0.0).astype(bf16)
        scores = jnp.dot(ssum, (q * k).astype(bf16),
                         preferred_element_type=f32) * scale  # (H, TA) f32, scale in f32

        # ---- numerically-stable softmax over T (stride-A residue classes).
        # For fixed (h, a) the T entries live at lanes {a, A+a, ..., (T-1)*A+a};
        # a cyclic roll tree reduces each class in place (T is a power of two).
        m = scores
        shift = A
        while shift < TA:
            m = jnp.maximum(m, pltpu.roll(m, shift=shift, axis=1))
            shift *= 2
        p = jnp.exp(scores - m)
        s = p
        shift = A
        while shift < TA:
            s = s + pltpu.roll(s, shift=shift, axis=1)
            shift *= 2
        prob = p / s                                           # (H, TA) f32

        # ---- broadcast probs over each head's E value channels (selector matmul)
        rr = jax.lax.broadcasted_iota(jnp.int32, (HE, H), 0)
        hh = jax.lax.broadcasted_iota(jnp.int32, (HE, H), 1)
        hexp = jnp.where((rr >= hh * E) & (rr < hh * E + E), 1.0, 0.0).astype(bf16)
        prob_b = jnp.dot(hexp, prob.astype(bf16),
                         preferred_element_type=f32).astype(bf16)   # (HE, TA) bf16

        # ---- weighted values -> final 1x1 conv: 1 push
        z = jnp.dot(wf_ref[...], prob_b * v,
                    preferred_element_type=f32)                # (E, TA) f32

        # ---- sum over T with the same roll tree; result is y replicated T times
        # along the lane axis (keeps the store lane-dense / unmasked).
        y = z
        shift = A
        while shift < TA:
            y = y + pltpu.roll(y, shift=shift, axis=1)
            shift *= 2
        y = y + bf_ref[...]                                    # (E, TA) + (E, 1) broadcast

        # ---- single merged lane-dense output slab (one output DMA)
        parts = [prob]
        if Hpad > H:
            parts.append(jnp.zeros((Hpad - H, TA), f32))
        parts.append(y)
        out_ref[...] = jnp.concatenate(parts, axis=0)          # (Hpad + E, TA)

    return kernel


def pack_fuser_params(params, num_heads):
    """Pre-pack torch-style interleaved conv weights into kernel slabs.

    Call ONCE at model init (outside the per-call jitted path): all the
    '(Qc H)' / '(C H)' re-layout and block-diagonal assembly happens here.
    """
    Wq, bq = params['q_proj']
    Wk, bk = params['k_proj']
    Wv, bv = params['v_proj']
    Wf, bf = params['final_fc']
    H = num_heads
    E = Wq.shape[1]
    Qc = Wq.shape[0] // H
    f32, bf16 = jnp.float32, jnp.bfloat16

    def head_major(W, b, C):
        # torch output channel o = c*H + h  ->  row h*C + c
        Ws = W.reshape(C, H, E).transpose(1, 0, 2).reshape(H * C, E)
        bs = b.reshape(C, H).T.reshape(H * C, 1)
        return Ws, bs

    wq_s, bq_s = head_major(Wq, bq, Qc)
    wk_s, bk_s = head_major(Wk, bk, Qc)
    wv_s, bv_s = head_major(Wv, bv, E)

    # Block-diagonal fused q/k/v weight, biases folded into the last column
    # (the activation slab carries a matching row of ones).
    w_qkv = jnp.concatenate([
        jnp.concatenate([wq_s, jnp.zeros_like(wq_s), bq_s], axis=1),
        jnp.concatenate([jnp.zeros_like(wk_s), wk_s, bk_s], axis=1),
        jnp.concatenate([jnp.zeros_like(wv_s), wv_s, bv_s], axis=1),
    ], axis=0).astype(bf16)                                    # (2*H*Qc + H*E, 2E + 1)

    # final_fc: torch input channel i = c*H + h  ->  column h*E + c
    w_f = Wf.reshape(E, E, H).transpose(0, 2, 1).reshape(E, H * E).astype(bf16)
    b_f = bf.reshape(E, 1).astype(f32)
    return {'w_qkv': w_qkv, 'w_f': w_f, 'b_f': b_f}


def anchor2tests_fuser(anchor_feats, test_feats, packed):
    """anchor_feats: (1, E, A), test_feats: (1, T, E, A); packed from pack_fuser_params."""
    assert anchor_feats.shape[0] == 1 and test_feats.shape[0] == 1
    _, T, E, A = test_feats.shape
    TA = T * A
    f32, bf16 = jnp.float32, jnp.bfloat16

    w_qkv, w_f, b_f = packed['w_qkv'], packed['w_f'], packed['b_f']
    HE = w_f.shape[1]
    H = HE // E
    HQc = (w_qkv.shape[0] - HE) // 2
    Qc = HQc // H
    assert w_qkv.shape[1] == 2 * E + 1 and w_f.shape[0] == E
    # Roll-tree reductions over T assume T is a power of two.
    assert T & (T - 1) == 0, "T must be a power of two"
    # TODO(synk): general (non power-of-two) T would need a masked/reshape-based T-reduction.

    # --- single activation slab (one input DMA): [anchor tiled over T ; test ; ones]
    anchor_t = jnp.tile(anchor_feats[0].astype(f32), (1, T))               # (E, TA)
    test2d = test_feats[0].astype(f32).transpose(1, 0, 2).reshape(E, TA)   # (E, TA)
    ones_row = jnp.ones((1, TA), f32)
    x_slab = jnp.concatenate([anchor_t, test2d, ones_row], axis=0).astype(bf16)

    Hpad = ((H + 7) // 8) * 8
    kernel = _make_fuser_kernel(H=H, Qc=Qc, E=E, T=T, A=A, Hpad=Hpad)

    flops = 2 * TA * (w_qkv.shape[0] * w_qkv.shape[1]   # fused qkv
                      + H * HQc                         # per-head Qc sum
                      + HE * H                          # prob head->channel broadcast
                      + E * HE)                         # final 1x1 conv
    bytes_accessed = (2 * (int(x_slab.size) + int(w_qkv.size) + int(w_f.size))
                      + 4 * int(b_f.size) + 4 * (Hpad + E) * TA)

    vmem = pl.BlockSpec(memory_space=pltpu.MemorySpace.VMEM)
    out = pl.pallas_call(
        kernel,
        out_shape=jax.ShapeDtypeStruct((Hpad + E, TA), f32),
        in_specs=[vmem] * 4,
        out_specs=vmem,
        cost_estimate=pl.CostEstimate(flops=flops,
                                      transcendentals=H * TA,
                                      bytes_accessed=bytes_accessed),
    )(x_slab, w_qkv, w_f, b_f)

    prob = out[:H]                                            # (H, TA), lane-dense
    y = out[Hpad:Hpad + E, :A]                                # (E, A)  (y replicated over T)
    attn_output = y.T                                         # (A, E)
    attn_weight = prob.reshape(H, T, A).transpose(2, 0, 1)[:, :, None, :]  # (A, H, 1, T)
    return {'attn_output': attn_output, 'attn_weight': attn_weight}


def reference_forward(anchor_feats, test_feats, params, H):
    """Pure-JAX f32 mirror of the PyTorch forward (torch channel ordering)."""
    Wq, bq = params['q_proj']
    Wk, bk = params['k_proj']
    Wv, bv = params['v_proj']
    Wf, bf = params['final_fc']
    _, T, E, A = test_feats.shape
    Qc = Wq.shape[0] // H
    anchor = anchor_feats[0]
    test = test_feats[0]
    q = Wq @ anchor + bq[:, None]                                      # (H*Qc, A)
    k = jnp.einsum('oe,tea->toa', Wk, test) + bk[None, :, None]        # (T, H*Qc, A)
    v = jnp.einsum('oe,tea->toa', Wv, test) + bv[None, :, None]        # (T, H*E, A)
    q_r = q.reshape(Qc, H, A).transpose(2, 0, 1)[..., None]            # (A, Qc, H, 1)
    k_r = k.reshape(T, Qc, H, A).transpose(3, 1, 2, 0)                 # (A, Qc, H, T)
    v_r = v.reshape(T, E, H, A).transpose(3, 1, 2, 0)                  # (A, E, H, T)
    scores = jnp.einsum('bdhn,bdhm->bhnm', q_r, k_r) / (Qc ** 0.5)     # (A, H, 1, T)
    prob = jax.nn.softmax(scores, axis=-1)
    x = jnp.einsum('bhnm,bdhm->bdhn', prob, v_r)                       # (A, E, H, 1)
    x = x.reshape(A, E * H)                                            # '(C H)' merge
    y = x @ Wf.T + bf[None, :]                                         # (A, E)
    return {'attn_output': y, 'attn_weight': prob}


if __name__ == "__main__":
    key = jax.random.PRNGKey(0)
    B, T, E, A = 1, 8, 32, 16          # in_c = E = 32
    H, qk_c = 4, 8                     # num_anchor2test_heads = 4
    keys = jax.random.split(key, 10)

    anchor_feats = jax.random.normal(keys[0], (B, E, A), jnp.float32)
    test_feats = jax.random.normal(keys[1], (B, T, E, A), jnp.float32)

    def init_w(k, shape, fan_in):
        bound = 1.0 / (fan_in ** 0.5)
        return jax.random.uniform(k, shape, jnp.float32, -bound, bound)

    params = {
        'q_proj': (init_w(keys[2], (H * qk_c, E), E), init_w(keys[3], (H * qk_c,), E)),
        'k_proj': (init_w(keys[4], (H * qk_c, E), E), init_w(keys[5], (H * qk_c,), E)),
        'v_proj': (init_w(keys[6], (H * E, E), E), init_w(keys[7], (H * E,), E)),
        'final_fc': (init_w(keys[8], (E, H * E), H * E), init_w(keys[9], (E,), H * E)),
    }

    # Pre-pack once, outside the per-call jitted path (perf item: weight glue).
    packed = pack_fuser_params(params, num_heads=H)

    fuser = jax.jit(anchor2tests_fuser)
    out = fuser(anchor_feats, test_feats, packed)
    jax.block_until_ready(out)

    ref = reference_forward(anchor_feats, test_feats, params, H)
    assert out['attn_output'].shape == (A, E)
    assert out['attn_weight'].shape == (A, H, 1, T)
    # bf16 MXU operands (f32 accumulate + f32 softmax): observed error vs the
    # f32 reference is ~1e-3; tolerances set with margin.
    assert jnp.allclose(out['attn_output'], ref['attn_output'], atol=2e-2, rtol=2e-2)
    assert jnp.allclose(out['attn_weight'], ref['attn_weight'], atol=2e-2, rtol=2e-2)
    print("KERNEL_OK")
</pallas_src>

<mosaic_0001>
module attributes {stable_mosaic.version = 11 : i64} {
  func.func @kernel(%arg0: memref<65x128xbf16, #tpu.memory_space<vmem>>, %arg1: memref<192x65xbf16, #tpu.memory_space<vmem>>, %arg2: memref<32x128xbf16, #tpu.memory_space<vmem>>, %arg3: memref<32x1xf32, #tpu.memory_space<vmem>>, %arg4: memref<40x128xf32, #tpu.memory_space<vmem>>) attributes {dimension_semantics = [], scalar_prefetch = 0 : i64, scratch_operands = 0 : i64, tpu.core_type = #tpu.core_type<tc>} {
    %c0 = arith.constant 0 : index
    %c0_0 = arith.constant 0 : index
    %0 = vector.load %arg1[%c0, %c0_0] : memref<192x65xbf16, #tpu.memory_space<vmem>>, vector<192x65xbf16>
    %c0_1 = arith.constant 0 : index
    %c0_2 = arith.constant 0 : index
    %1 = vector.load %arg0[%c0_1, %c0_2] : memref<65x128xbf16, #tpu.memory_space<vmem>>, vector<65x128xbf16>
    %cst = arith.constant dense<0.000000e+00> : vector<192x128xf32>
    %2 = tpu.matmul %0, %1, %cst {dimension_numbers = #tpu.dot_dimension_numbers<[1], [0], [0], [1], [0, 0, 1, 1], [], []>} : vector<192x65xbf16>, vector<65x128xbf16>, vector<192x128xf32> -> vector<192x128xf32>
    %3 = vector.extract_strided_slice %2 {offsets = [0, 0], sizes = [32, 128], strides = [1, 1]} : vector<192x128xf32> to vector<32x128xf32>
    %4 = vector.extract_strided_slice %2 {offsets = [32, 0], sizes = [32, 128], strides = [1, 1]} : vector<192x128xf32> to vector<32x128xf32>
    %5 = vector.extract_strided_slice %2 {offsets = [64, 0], sizes = [128, 128], strides = [1, 1]} : vector<192x128xf32> to vector<128x128xf32>
    %6 = arith.truncf %5 : vector<128x128xf32> to vector<128x128xbf16>
    %7 = tpu.iota {dimensions = array<i32: 1>} : vector<4x32xi32>
    %8 = tpu.iota {dimensions = array<i32: 0>} : vector<4x32xi32>
    %c8_i32 = arith.constant 8 : i32
    %9 = vector.broadcast %c8_i32 : i32 to vector<4x32xi32>
    %10 = arith.muli %8, %9 : vector<4x32xi32>
    %11 = arith.cmpi sge, %7, %10 : vector<4x32xi32>
    %c8_i32_3 = arith.constant 8 : i32
    %12 = vector.broadcast %c8_i32_3 : i32 to vector<4x32xi32>
    %13 = arith.muli %8, %12 : vector<4x32xi32>
    %c8_i32_4 = arith.constant 8 : i32
    %14 = vector.broadcast %c8_i32_4 : i32 to vector<4x32xi32>
    %15 = arith.addi %13, %14 : vector<4x32xi32>
    %16 = arith.cmpi slt, %7, %15 : vector<4x32xi32>
    %17 = arith.andi %11, %16 : vector<4x32xi1>
    %cst_5 = arith.constant 1.000000e+00 : f32
    %cst_6 = arith.constant 0.000000e+00 : f32
    %18 = vector.broadcast %cst_5 : f32 to vector<4x32xf32>
    %19 = vector.broadcast %cst_6 : f32 to vector<4x32xf32>
    %20 = arith.select %17, %18, %19 : vector<4x32xi1>, vector<4x32xf32>
    %21 = arith.truncf %20 : vector<4x32xf32> to vector<4x32xbf16>
    %22 = arith.mulf %3, %4 : vector<32x128xf32>
    %23 = arith.truncf %22 : vector<32x128xf32> to vector<32x128xbf16>
    %cst_7 = arith.constant dense<0.000000e+00> : vector<4x128xf32>
    %24 = tpu.matmul %21, %23, %cst_7 {dimension_numbers = #tpu.dot_dimension_numbers<[1], [0], [0], [1], [0, 0, 1, 1], [], []>} : vector<4x32xbf16>, vector<32x128xbf16>, vector<4x128xf32> -> vector<4x128xf32>
    %cst_8 = arith.constant 0.353553385 : f32
    %25 = vector.broadcast %cst_8 : f32 to vector<4x128xf32>
    %26 = arith.mulf %24, %25 : vector<4x128xf32>
    %c16_i32 = arith.constant 16 : i32
    %27 = tpu.dynamic_rotate %26 by %c16_i32 dim 1 : vector<4x128xf32>, i32 -> vector<4x128xf32>
    %28 = arith.maximumf %26, %27 : vector<4x128xf32>
    %c32_i32 = arith.constant 32 : i32
    %29 = tpu.dynamic_rotate %28 by %c32_i32 dim 1 : vector<4x128xf32>, i32 -> vector<4x128xf32>
    %30 = arith.maximumf %28, %29 : vector<4x128xf32>
    %c64_i32 = arith.constant 64 : i32
    %31 = tpu.dynamic_rotate %30 by %c64_i32 dim 1 : vector<4x128xf32>, i32 -> vector<4x128xf32>
    %32 = arith.maximumf %30, %31 : vector<4x128xf32>
    %33 = arith.subf %26, %32 : vector<4x128xf32>
    %34 = math.exp %33 : vector<4x128xf32>
    %c16_i32_9 = arith.constant 16 : i32
    %35 = tpu.dynamic_rotate %34 by %c16_i32_9 dim 1 : vector<4x128xf32>, i32 -> vector<4x128xf32>
    %36 = arith.addf %34, %35 : vector<4x128xf32>
    %c32_i32_10 = arith.constant 32 : i32
    %37 = tpu.dynamic_rotate %36 by %c32_i32_10 dim 1 : vector<4x128xf32>, i32 -> vector<4x128xf32>
    %38 = arith.addf %36, %37 : vector<4x128xf32>
    %c64_i32_11 = arith.constant 64 : i32
    %39 = tpu.dynamic_rotate %38 by %c64_i32_11 dim 1 : vector<4x128xf32>, i32 -> vector<4x128xf32>
    %40 = arith.addf %38, %39 : vector<4x128xf32>
    %41 = arith.divf %34, %40 : vector<4x128xf32>
    %42 = tpu.iota {dimensions = array<i32: 0>} : vector<128x4xi32>
    %43 = tpu.iota {dimensions = array<i32: 1>} : vector<128x4xi32>
    %c32_i32_12 = arith.constant 32 : i32
    %44 = vector.broadcast %c32_i32_12 : i32 to vector<128x4xi32>
    %45 = arith.muli %43, %44 : vector<128x4xi32>
    %46 = arith.cmpi sge, %42, %45 : vector<128x4xi32>
    %c32_i32_13 = arith.constant 32 : i32
    %47 = vector.broadcast %c32_i32_13 : i32 to vector<128x4xi32>
    %48 = arith.muli %43, %47 : vector<128x4xi32>
    %c32_i32_14 = arith.constant 32 : i32
    %49 = vector.broadcast %c32_i32_14 : i32 to vector<128x4xi32>
    %50 = arith.addi %48, %49 : vector<128x4xi32>
    %51 = arith.cmpi slt, %42, %50 : vector<128x4xi32>
    %52 = arith.andi %46, %51 : vector<128x4xi1>
    %cst_15 = arith.constant 1.000000e+00 : f32
    %cst_16 = arith.constant 0.000000e+00 : f32
    %53 = vector.broadcast %cst_15 : f32 to vector<128x4xf32>
    %54 = vector.broadcast %cst_16 : f32 to vector<128x4xf32>
    %55 = arith.select %52, %53, %54 : vector<128x4xi1>, vector<128x4xf32>
    %56 = arith.truncf %55 : vector<128x4xf32> to vector<128x4xbf16>
    %57 = arith.truncf %41 : vector<4x128xf32> to vector<4x128xbf16>
    %cst_17 = arith.constant dense<0.000000e+00> : vector<128x128xf32>
    %58 = tpu.matmul %56, %57, %cst_17 {dimension_numbers = #tpu.dot_dimension_numbers<[1], [0], [0], [1], [0, 0, 1, 1], [], []>} : vector<128x4xbf16>, vector<4x128xbf16>, vector<128x128xf32> -> vector<128x128xf32>
    %59 = arith.truncf %58 : vector<128x128xf32> to vector<128x128xbf16>
    %c0_18 = arith.constant 0 : index
    %c0_19 = arith.constant 0 : index
    %60 = vector.load %arg2[%c0_18, %c0_19] : memref<32x128xbf16, #tpu.memory_space<vmem>>, vector<32x128xbf16>
    %61 = arith.mulf %59, %6 : vector<128x128xbf16>
    %cst_20 = arith.constant dense<0.000000e+00> : vector<32x128xf32>
    %62 = tpu.matmul %60, %61, %cst_20 {dimension_numbers = #tpu.dot_dimension_numbers<[1], [0], [0], [1], [0, 0, 1, 1], [], []>} : vector<32x128xbf16>, vector<128x128xbf16>, vector<32x128xf32> -> vector<32x128xf32>
    %c16_i32_21 = arith.constant 16 : i32
    %63 = tpu.dynamic_rotate %62 by %c16_i32_21 dim 1 : vector<32x128xf32>, i32 -> vector<32x128xf32>
    %64 = arith.addf %62, %63 : vector<32x128xf32>
    %c32_i32_22 = arith.constant 32 : i32
    %65 = tpu.dynamic_rotate %64 by %c32_i32_22 dim 1 : vector<32x128xf32>, i32 -> vector<32x128xf32>
    %66 = arith.addf %64, %65 : vector<32x128xf32>
    %c64_i32_23 = arith.constant 64 : i32
    %67 = tpu.dynamic_rotate %66 by %c64_i32_23 dim 1 : vector<32x128xf32>, i32 -> vector<32x128xf32>
    %68 = arith.addf %66, %67 : vector<32x128xf32>
    %c0_24 = arith.constant 0 : index
    %c0_25 = arith.constant 0 : index
    %69 = vector.load %arg3[%c0_24, %c0_25] : memref<32x1xf32, #tpu.memory_space<vmem>>, vector<32x1xf32>
    %70 = vector.broadcast %69 : vector<32x1xf32> to vector<32x128xf32>
    %71 = arith.addf %68, %70 : vector<32x128xf32>
    %cst_26 = arith.constant 0.000000e+00 : f32
    %72 = vector.broadcast %cst_26 : f32 to vector<4x128xf32>
    %73 = tpu.concatenate %41, %72, %71 in 0 : vector<4x128xf32>, vector<4x128xf32>, vector<32x128xf32> -> vector<40x128xf32>
    %c0_27 = arith.constant 0 : index
    %c0_28 = arith.constant 0 : index
    %74 = vector.load %arg4[%c0_27, %c0_28] : memref<40x128xf32, #tpu.memory_space<vmem>>, vector<40x128xf32>
    tpu.vector_store %arg4[%c0_27, %c0_28], %73 {strides = array<i32>} : memref<40x128xf32, #tpu.memory_space<vmem>>, vector<40x128xf32>,
    return
  }
}

</mosaic_0001>

<bundles_post_ra>
// kernel: anchor2tests_fuser.1
= control target key start
LH: loop header
LB: loop body
LE: loop exit
PB: predicated region body
PF: predicated region fallthrough
CT: control target
= control target key end

     0   :  { %vm175_vm0 = vcmask 1040384   ;;  %v815_v1 = vmov 0   ;;  %vm138_vm1 = vcmask 531456   ;;  %v266_v19 = vlaneseq  ;;  %s817_s6 = smov 16   ;;  %s818_s7 = smov 32   ;;  %s1074_s0 = inlined_call_operand.vmem [shape: bf16[65,128], index: 0, kind: input, shape index: {}]   ;;  %s1075_s1 = inlined_call_operand.vmem [shape: bf16[192,65], index: 1, kind: input, shape index: {}]   ;;  %s1076_s4 = inlined_call_operand.vmem [shape: f32[40,128], index: 4, kind: output, shape index: {}]   ;;  %s1077_s2 = inlined_call_operand.vmem [shape: bf16[32,128], index: 2, kind: input, shape index: {}]   ;;  %s1078_s3 = inlined_call_operand.vmem [shape: f32[32,1], index: 3, kind: input, shape index: {}]  }
   0x1   :  { %v50_v0 = vld [vmem:[%s1074_s0 + $0x20] sm:$0x1]  ;;  %809 = vset.pattern.permute.xlu1 %v815_v1  ;;  %808 = vset.pattern.permute.xlu0 %v815_v1  ;;  %v177_v3 = vsel %vm175_vm0, 65535, %v815_v1  ;;  %v795_v6 = vld [vmem:[%s1074_s0 + $0x18] sm:$0xff]  ;;  %v794_v7 = vld [vmem:[%s1074_s0 + $0x10] sm:$0xff]  ;;  %v816_v32 = vmov 0.0  }
   0x2   :  { %v128_v2 = vunpack.c.l.b16 %v50_v0  ;;  %810 = vset.pattern.permute.xlu2 %v815_v1  ;;  %v793_v8 = vld [vmem:[%s1074_s0 + $0x8] sm:$0xff]  ;;  %v792_v9 = vld [vmem:[%s1074_s0] sm:$0xff]  ;;  %v782_v12 = vld [vmem:[%s1075_s1 + $0x10] sm:$0xff]  ;;  %v876_v21 = vshrl.u32 %v266_v19, 7  ;;  %v267_v24 = vand.u32 127, %v266_v19  ;;  %vm283_vm5 = vcmask 261120  }
   0x3   :  { %v780_v10 = vld [vmem:[%s1075_s1] sm:$0xff]  ;;  %v781_v11 = vld [vmem:[%s1075_s1 + $0x8] sm:$0xff]  ;;  %v783_v13 = vld [vmem:[%s1075_s1 + $0x18] sm:$0xff]  ;;  %s819_s8 = smov 64   ;;  %vm676_vm0 = vcmask 1043456  }
   0x4   :  { %v133_v4 = vpack.c.b16 %v128_v2, %v128_v2  ;;  %v270_v22 = vmul.u32 8, %v876_v21  ;;  %v784_v52 = vld [vmem:[%s1075_s1 + $0x20] sm:$0xff]  ;;  %v890_v55 = vmul.u32 32, %v267_v24  ;;  %v337_v59 = vadd.s32 8, %v876_v21  ;;  %v785_v61 = vld [vmem:[%s1075_s1 + $0x28] sm:$0xff]  ;;  %v786_v62 = vld [vmem:[%s1075_s1 + $0x30] sm:$0xff] }
   0x5   :  { %v340_v19 = vadd.s32 32, %v876_v21 }
   0x6   :  { %v179_v5 = vand.u32 %v177_v3, %v133_v4  ;;  %v272_v25 = vadd.s32 8, %v270_v22  ;;  %vm271_vm2 = vcmp.ge.s32.totalorder %v267_v24, %v270_v22  ;;  %v893_v57 = vadd.s32 32, %v890_v55  ;;  %v788_v22 = vld [vmem:[%s1075_s1 + $0x40] sm:$0xff] }
   0x7   :  { %vm353_vm6 = vcmp.ge.s32.totalorder %v876_v21, %v890_v55  ;;  %vm354_vm9 = vcmp.ge.s32.totalorder %v337_v59, %v890_v55 }
   0x8   :  { %184 = vmatpush.bf16.msra.mxu0 %v179_v5  ;;  %798 = vmatpush.bf16.msra.mxu1 %v179_v5  ;;  %vm273_vm3 = vcmp.lt.s32.totalorder %v267_v24, %v272_v25  ;;  %vm370_vm7 = vcmp.lt.s32.totalorder %v876_v21, %v893_v57  ;;  %vm371_vm10 = vcmp.lt.s32.totalorder %v337_v59, %v893_v57 }
   0x9   :  { %vm274_vm4 = vmand %vm271_vm2, %vm273_vm3  ;;  %vm452_vm2 = vcmask 1041408   ;;  %vm427_vm3 = vcmask 31744  }
   0xa   :  { %v275_v33 = vsel %vm274_vm4, 1.0, %v816_v32  ;;  %vm386_vm12 = vmand %vm353_vm6, %vm370_vm7 }
   0xb   :  { %v276_v35 = vpack.c.bf16 %v275_v33, %v275_v33  ;;  %vm387_vm15 = vmand %vm354_vm9, %vm371_vm10  ;;  %vm357_vm10 = vcmp.ge.s32.totalorder %v340_v19, %v890_v55  ;;  %v344_v33 = vadd.s32 64, %v876_v21 }
   0xc   :  { %185 = vmatpush.bf16.msra.mxu0 %v795_v6  ;;  %799 = vmatpush.bf16.msra.mxu1 %v795_v6 }
  0x10   :  { %186 = vmatpush.bf16.msra.mxu0 %v794_v7  ;;  %800 = vmatpush.bf16.msra.mxu1 %v794_v7  ;;  %v402_v7 = vsel %vm386_vm12, 1.0, %v816_v32 }
  0x14   :  { %187 = vmatpush.bf16.msra.mxu0 %v793_v8  ;;  %801 = vmatpush.bf16.msra.mxu1 %v793_v8  ;;  %v403_v8 = vsel %vm387_vm15, 1.0, %v816_v32 }
  0x18   :  { %188 = vmatpush.bf16.msra.mxu0 %v792_v9  ;;  %802 = vmatpush.bf16.msra.mxu1 %v792_v9 }
  0x1b   :  { %751 = vmatmul.msk.bf16.vlgmr.msra.gmra.mxu0 %vm138_vm1, %v780_v10  ;;  %757 = vmatmul.msk.bf16.vlgmr.msra.gmra.mxu1 %vm138_vm1, %v786_v62 }
  0x2b   :  { %752 = vmatmul.msk.bf16.gmra.mxu0 %vm138_vm1, %v781_v11 }
  0x3b   :  { %753 = vmatmul.msk.bf16.gmra.mxu0 %vm138_vm1, %v782_v12  ;;  %v418_v12 = vpack.c.bf16 %v403_v8, %v402_v7 }
  0x4b   :  { %754 = vmatmul.msk.bf16.gmra.mxu0 %vm138_vm1, %v783_v13  ;;  %v338_v13 = vadd.s32 16, %v876_v21 }
  0x4d   :  { %vm355_vm4 = vcmp.ge.s32.totalorder %v338_v13, %v890_v55 }
  0x5b   :  { %755 = vmatmul.msk.bf16.gmra.mxu0 %vm138_vm1, %v784_v52 }
  0x6b   :  { %756 = vmatmul.msk.bf16.gmra.mxu0 %vm138_vm1, %v785_v61 }
  0x98   :  { %v190_v14 = vpop.f32.mrf.mxu0  ;;  %v220_v62 = vpop.f32.mrf.mxu1 }
  0xa0   :  { %v192_v15 = vpop.f32.mrf.mxu0  ;;  %v222_v7 = vpop.f32.mrf.mxu1 }
  0xa8   :  { %v195_v16 = vpop.f32.mrf.mxu0 }
  0xb0   :  { %v197_v17 = vpop.f32.mrf.mxu0 }
  0xb8   :  { %v200_v18 = vpop.f32.mrf.mxu0 }
  0xb9   :  { %v277_v31 = vmul.f32 %v200_v18, %v190_v14  ;;  %v339_v14 = vadd.s32 24, %v876_v21 }
  0xbb   :  { %vm356_vm6 = vcmp.ge.s32.totalorder %v339_v14, %v890_v55  ;;  %vm373_vm7 = vcmp.lt.s32.totalorder %v339_v14, %v893_v57 }
  0xbc   :  { %vm389_vm9 = vmand %vm356_vm6, %vm373_vm7 }
  0xc0   :  { %v202_v20 = vpop.f32.mrf.mxu0 }
  0xc1   :  { %v278_v29 = vmul.f32 %v202_v20, %v192_v15  ;;  %v787_v15 = vld [vmem:[%s1075_s1 + $0x38] sm:$0xff]  ;;  %v341_v20 = vadd.s32 40, %v876_v21 }
  0xc2   :  { %758 = vmatmul.msk.bf16.gmra.mxu1 %vm138_vm1, %v787_v15 }
  0xc3   :  { %v281_v34 = vpack.c.bf16 %v278_v29, %v277_v31  ;;  %vm358_vm12 = vcmp.ge.s32.totalorder %v341_v20, %v890_v55 }
  0xc8   :  { %v205_v23 = vpop.f32.mrf.mxu0 }
  0xc9   :  { %v279_v27 = vmul.f32 %v205_v23, %v195_v16 }
  0xd0   :  { %v207_v26 = vpop.f32.mrf.mxu0 }
  0xd1   :  { %v280_v28 = vmul.f32 %v207_v26, %v197_v17  ;;  %v405_v17 = vsel %vm389_vm9, 1.0, %v816_v32  ;;  %v342_v26 = vadd.s32 48, %v876_v21  ;;  %vm378_vm9 = vcmp.lt.s32.totalorder %v344_v33, %v893_v57 }
  0xd2   :  { %759 = vmatmul.msk.bf16.gmra.mxu1 %vm138_vm1, %v788_v22 }
  0xd3   :  { %v282_v30 = vpack.c.bf16 %v280_v28, %v279_v27  ;;  %v343_v27 = vadd.s32 56, %v876_v21  ;;  %v789_v28 = vld [vmem:[%s1075_s1 + $0x48] sm:$0xff] }
  0xd5   :  { %293 = vmatpush.bf16.msra.mxu3 %v282_v30 }
  0xd9   :  { %294 = vmatpush.bf16.msra.mxu3 %v281_v34  ;;  %v345_v34 = vadd.s32 72, %v876_v21 }
  0xdc   :  { %763 = vmatmul.msk.bf16.vlgmr.msra.gmra.mxu3 %vm283_vm5, %v276_v35  ;;  %vm372_vm5 = vcmp.lt.s32.totalorder %v338_v13, %v893_v57  ;;  %v790_v35 = vld [vmem:[%s1075_s1 + $0x50] sm:$0xff] }
  0xe2   :  { %760 = vmatmul.msk.bf16.gmra.mxu1 %vm138_vm1, %v789_v28 }
  0xf2   :  { %761 = vmatmul.msk.bf16.gmra.mxu1 %vm138_vm1, %v790_v35 }
 0x15f   :  { %v296_v36 = vpop.f32.mrf.mxu3 }
 0x160   :  { %v300_v37 = vmul.f32 0.35355338, %v296_v36 }
 0x162   :  { %301 = vrot.lane.b32.xlu0 %v300_v37, %s817_s6 }
 0x167   :  { %v298_v38 = vpop.f32.mrf.mxu3 }
 0x1d4   :  { %v302_v39 = vpop.permute.xlu0 %301 }
 0x1d5   :  { %v303_v40 = vmax.f32 %v300_v37, %v302_v39  ;;  %v346_v39 = vadd.s32 80, %v876_v21 }
 0x1d7   :  { %304 = vrot.lane.b32.xlu0 %v303_v40, %s818_s7 }
 0x249   :  { %v305_v41 = vpop.permute.xlu0 %304 }
 0x24a   :  { %v306_v42 = vmax.f32 %v303_v40, %v305_v41  ;;  %v347_v40 = vadd.s32 88, %v876_v21  ;;  %v791_v41 = vld [vmem:[%s1075_s1 + $0x58] sm:$0xff] }
 0x24b   :  { %762 = vmatmul.msk.bf16.gmra.mxu1 %vm138_vm1, %v791_v41 }
 0x24c   :  { %307 = vrot.lane.b32.xlu1 %v306_v42, %s819_s8 }
 0x2be   :  { %v308_v43 = vpop.permute.xlu1 %307 }
 0x2bf   :  { %v309_v44 = vmax.f32 %v306_v42, %v308_v43 }
 0x2c1   :  { %v310_v45 = vsub.f32 %v300_v37, %v309_v44 }
 0x2c3   :  { %v311_v46 = vmul.f32 1.442695, %v310_v45  ;;  %v348_v45 = vadd.s32 96, %v876_v21 }
 0x2c5   :  { %811 = vpow2.f32 %v311_v46  ;;  %v349_v46 = vadd.s32 104, %v876_v21  ;;  %vm382_vm1 = vcmp.lt.s32.totalorder %v348_v45, %v893_v57 }
 0x2cb   :  { %v812_v47 = vpop.eup %811 }
 0x2cc   :  { %313 = vrot.lane.b32.xlu1 %v812_v47, %s817_s6 }
 0x33e   :  { %v314_v48 = vpop.permute.xlu1 %313 }
 0x33f   :  { %v315_v49 = vadd.f32 %v812_v47, %v314_v48 }
 0x341   :  { %316 = vrot.lane.b32.xlu2 %v315_v49, %s818_s7 }
 0x39b   :  { %v317_v50 = vpop.permute.xlu2 %316 }
 0x39c   :  { %v318_v51 = vadd.f32 %v317_v50, %v315_v49  ;;  %v350_v50 = vadd.s32 112, %v876_v21 }
 0x39e   :  { %319 = vrot.lane.b32.xlu2 %v318_v51, %s819_s8 }
 0x3f8   :  { %v320_v53 = vpop.permute.xlu2 %319 }
 0x3f9   :  { %v321_v54 = vadd.f32 %v320_v53, %v318_v51  ;;  %v351_v51 = vadd.s32 120, %v876_v21  ;;  %v210_v21 = vpop.f32.mrf.mxu0 }
 0x3fa   :  { %v250_v59 = vpack.c.bf16 %v210_v21, %v210_v21 }
 0x3fb   :  { %813 = vrcp.f32 %v321_v54  ;;  %v333_v63 = vand.u32 2147483648, %v321_v54  ;;  %v331_v1 = vand.u32 2147483647, %v321_v54  ;;  %vm327_vm11 = vweird.f32 %v321_v54 }
 0x3fd   :  { %v334_v3 = vor.u32 1.1754944e-38, %v333_v63  ;;  %vm332_vm14 = vcmp.eq.f32.partialorder %v331_v1, 8.507059e+37 }
 0x401   :  { %v814_v56 = vpop.eup %813 }
 0x402   :  { %v323_v58 = vmul.f32 %v814_v56, %v321_v54  ;;  %vm328_vm8 = vweird.f32 %v814_v56 }
 0x403   :  { %vm329_vm13 = vmor %vm327_vm11, %vm328_vm8  ;;  %vm374_vm11 = vcmp.lt.s32.totalorder %v340_v19, %v893_v57 }
 0x404   :  { %v324_v60 = vsub.f32 1.0, %v323_v58  ;;  %vm388_vm8 = vmand %vm355_vm4, %vm372_vm5  ;;  %vm360_vm4 = vcmp.ge.s32.totalorder %v343_v27, %v890_v55  ;;  %vm377_vm5 = vcmp.lt.s32.totalorder %v343_v27, %v893_v57 }
 0x405   :  { %v404_v16 = vsel %vm388_vm8, 1.0, %v816_v32  ;;  %vm393_vm7 = vmand %vm360_vm4, %vm377_vm5  ;;  %vm361_vm8 = vcmp.ge.s32.totalorder %v344_v33, %v890_v55 }
 0x406   :  { %v325_v0 = vmul.f32 %v814_v56, %v324_v60  ;;  %v419_v18 = vpack.c.bf16 %v405_v17, %v404_v16  ;;  %v409_v30 = vsel %vm393_vm7, 1.0, %v816_v32  ;;  %vm366_vm7 = vcmp.ge.s32.totalorder %v349_v46, %v890_v55  ;;  %v225_v17 = vpop.f32.mrf.mxu1 }
 0x408   :  { %v326_v2 = vadd.f32 %v814_v56, %v325_v0  ;;  %v541_v0 = vunpack.c.l.bf16 %v250_v59 }
 0x40a   :  { %v330_v4 = vsel %vm329_vm13, %v814_v56, %v326_v2  ;;  %vm375_vm13 = vcmp.lt.s32.totalorder %v341_v20, %v893_v57  ;;  %v212_v56 = vpop.f32.mrf.mxu0  ;;  %v254_v20 = vpack.c.bf16 %v220_v62, %v220_v62 }
 0x40b   :  { %v335_v5 = vsel %vm332_vm14, %v334_v3, %v330_v4  ;;  %vm390_vm14 = vmand %vm357_vm10, %vm374_vm11  ;;  %vm362_vm10 = vcmp.ge.s32.totalorder %v345_v34, %v890_v55  ;;  %vm379_vm11 = vcmp.lt.s32.totalorder %v345_v34, %v893_v57  ;;  %v251_v61 = vpack.c.bf16 %v212_v56, %v212_v56 }
 0x40c   :  { %v336_v6 = vmul.f32 %v812_v47, %v335_v5  ;;  %vm391_vm15 = vmand %vm358_vm12, %vm375_vm13  ;;  %v406_v23 = vsel %vm390_vm14, 1.0, %v816_v32  ;;  %vm363_vm14 = vcmp.ge.s32.totalorder %v346_v39, %v890_v55 }
 0x40d   :  { %v407_v24 = vsel %vm391_vm15, 1.0, %v816_v32  ;;  %vm394_vm12 = vmand %vm361_vm8, %vm378_vm9  ;;  %vm380_vm15 = vcmp.lt.s32.totalorder %v346_v39, %v893_v57  ;;  %vm383_vm8 = vcmp.lt.s32.totalorder %v349_v46, %v893_v57  ;;  %v542_v1 = vunpack.c.l.bf16 %v251_v61 }
 0x40e   :  { %v426_v9 = vpack.c.bf16 %v336_v6, %v336_v6  ;;  %v677_v10 = vsel %vm676_vm0, %v336_v6, 0.0  ;;  %v420_v25 = vpack.c.bf16 %v407_v24, %v406_v23  ;;  %vm359_vm0 = vcmp.ge.s32.totalorder %v342_v26, %v890_v55  ;;  %vm395_vm13 = vmand %vm362_vm10, %vm379_vm11  ;;  %v227_v28 = vpop.f32.mrf.mxu1 }
 0x40f   :  { %678 = vst [vmem:[%s1076_s4] sm:$0xff] %v677_v10  ;;  %v410_v36 = vsel %vm394_vm12, 1.0, %v816_v32  ;;  %v411_v37 = vsel %vm395_vm13, 1.0, %v816_v32  ;;  %vm396_vm4 = vmand %vm363_vm14, %vm380_vm15  ;;  %vm367_vm11 = vcmp.ge.s32.totalorder %v350_v50, %v890_v55  ;;  %vm384_vm12 = vcmp.lt.s32.totalorder %v350_v50, %v893_v57 }
 0x410   :  { %v454_v11 = vsel %vm452_vm2, %v426_v9, 0  ;;  %vm376_vm2 = vcmp.lt.s32.totalorder %v342_v26, %v893_v57  ;;  %v422_v38 = vpack.c.bf16 %v411_v37, %v410_v36  ;;  %v412_v42 = vsel %vm396_vm4, 1.0, %v816_v32  ;;  %vm399_vm10 = vmand %vm366_vm7, %vm383_vm8 }
 0x411   :  { %463 = vmatpush.bf16.msra.mxu2 %v454_v11  ;;  %vm392_vm6 = vmand %vm359_vm0, %vm376_vm2  ;;  %vm364_vm0 = vcmp.ge.s32.totalorder %v347_v40, %v890_v55  ;;  %vm381_vm2 = vcmp.lt.s32.totalorder %v347_v40, %v893_v57  ;;  %v415_v48 = vsel %vm399_vm10, 1.0, %v816_v32  ;;  %vm368_vm13 = vcmp.ge.s32.totalorder %v351_v51, %v890_v55 }
 0x412   :  { %v408_v29 = vsel %vm392_vm6, 1.0, %v816_v32  ;;  %vm397_vm5 = vmand %vm364_vm0, %vm381_vm2  ;;  %vm365_vm6 = vcmp.ge.s32.totalorder %v348_v45, %v890_v55  ;;  %vm385_vm14 = vcmp.lt.s32.totalorder %v351_v51, %v893_v57  ;;  %v215_v55 = vpop.f32.mrf.mxu0  ;;  %v256_v36 = vpack.c.bf16 %v225_v17, %v225_v17 }
 0x413   :  { %v421_v31 = vpack.c.bf16 %v409_v30, %v408_v29  ;;  %v413_v43 = vsel %vm397_vm5, 1.0, %v816_v32  ;;  %vm398_vm9 = vmand %vm365_vm6, %vm382_vm1  ;;  %v252_v9 = vpack.c.bf16 %v215_v55, %v215_v55  ;;  %v255_v30 = vpack.c.bf16 %v222_v7, %v222_v7 }
 0x414   :  { %764 = vmatmul.msk.bf16.vlgmr.msra.gmra.mxu2 %vm427_vm3, %v418_v12  ;;  %v423_v44 = vpack.c.bf16 %v413_v43, %v412_v42  ;;  %v414_v47 = vsel %vm398_vm9, 1.0, %v816_v32  ;;  %vm400_vm15 = vmand %vm367_vm11, %vm384_vm12  ;;  %v547_v41 = vunpack.c.l.bf16 %v256_v36  ;;  %v257_v45 = vpack.c.bf16 %v227_v28, %v227_v28 }
 0x415   :  { %v424_v49 = vpack.c.bf16 %v415_v48, %v414_v47  ;;  %vm401_vm0 = vmand %vm368_vm13, %vm385_vm14  ;;  %v416_v52 = vsel %vm400_vm15, 1.0, %v816_v32  ;;  %v543_v13 = vunpack.c.l.bf16 %v252_v9  ;;  %v546_v34 = vunpack.c.l.bf16 %v255_v30 }
 0x416   :  { %v417_v53 = vsel %vm401_vm0, 1.0, %v816_v32 }
 0x417   :  { %v425_v54 = vpack.c.bf16 %v417_v53, %v416_v52 }
 0x41a   :  { %v217_v8 = vpop.f32.mrf.mxu0 }
 0x41b   :  { %v253_v11 = vpack.c.bf16 %v217_v8, %v217_v8 }
 0x41d   :  { %v544_v15 = vunpack.c.l.bf16 %v253_v11 }
 0x424   :  { %765 = vmatmul.msk.bf16.gmra.mxu2 %vm427_vm3, %v419_v18 }
 0x434   :  { %766 = vmatmul.msk.bf16.gmra.mxu2 %vm427_vm3, %v420_v25  ;;  %v545_v25 = vunpack.c.l.bf16 %v254_v20 }
 0x444   :  { %767 = vmatmul.msk.bf16.gmra.mxu2 %vm427_vm3, %v421_v31 }
 0x454   :  { %768 = vmatmul.msk.bf16.gmra.mxu2 %vm427_vm3, %v422_v38  ;;  %v230_v38 = vpop.f32.mrf.mxu1 }
 0x455   :  { %v258_v51 = vpack.c.bf16 %v230_v38, %v230_v38 }
 0x457   :  { %v549_v21 = vunpack.c.l.bf16 %v258_v51 }
 0x45c   :  { %v232_v47 = vpop.f32.mrf.mxu1 }
 0x464   :  { %769 = vmatmul.msk.bf16.gmra.mxu2 %vm427_vm3, %v423_v44 }
 0x474   :  { %770 = vmatmul.msk.bf16.gmra.mxu2 %vm427_vm3, %v424_v49  ;;  %v548_v49 = vunpack.c.l.bf16 %v257_v45 }
 0x484   :  { %771 = vmatmul.msk.bf16.gmra.mxu2 %vm427_vm3, %v425_v54 }
 0x497   :  { %v465_v58 = vpop.f32.mrf.mxu2 }
 0x498   :  { %v505_v60 = vpack.c.bf16 %v465_v58, %v465_v58  ;;  %v235_v58 = vpop.f32.mrf.mxu1 }
 0x49a   :  { %v525_v57 = vunpack.c.l.bf16 %v505_v60 }
 0x49c   :  { %v999_v4 = vmul.f32 %v541_v0, %v525_v57 }
 0x49f   :  { %v467_v63 = vpop.f32.mrf.mxu2 }
 0x4a0   :  { %v506_v2 = vpack.c.bf16 %v467_v63, %v467_v63  ;;  %v237_v62 = vpop.f32.mrf.mxu1 }
 0x4a1   :  { %v261_v28 = vpack.c.bf16 %v237_v62, %v237_v62  ;;  %v649_v62 = vld [vmem:[%s1078_s3 + $0x8] sm:$0xff] }
 0x4a2   :  { %v526_v3 = vunpack.c.l.bf16 %v506_v2 }
 0x4a3   :  { %v552_v45 = vunpack.c.l.bf16 %v261_v28 }
 0x4a4   :  { %v1001_v32 = vmul.f32 %v542_v1, %v526_v3 }
 0x4a6   :  { %v573_v5 = vpack.c.bf16 %v1001_v32, %v999_v4 }
 0x4a7   :  { %v470_v6 = vpop.f32.mrf.mxu2 }
 0x4a8   :  { %v507_v10 = vpack.c.bf16 %v470_v6, %v470_v6  ;;  %v240_v55 = vpop.f32.mrf.mxu1 }
 0x4aa   :  { %v527_v14 = vunpack.c.l.bf16 %v507_v10 }
 0x4ac   :  { %v1005_v19 = vmul.f32 %v543_v13, %v527_v14 }
 0x4af   :  { %v472_v12 = vpop.f32.mrf.mxu2 }
 0x4b0   :  { %v508_v16 = vpack.c.bf16 %v472_v12, %v472_v12  ;;  %v242_v57 = vpop.f32.mrf.mxu1  ;;  %v262_v12 = vpack.c.bf16 %v240_v55, %v240_v55 }
 0x4b1   :  { %v263_v13 = vpack.c.bf16 %v242_v57, %v242_v57  ;;  %v648_v57 = vld [vmem:[%s1078_s3] sm:$0xff] }
 0x4b2   :  { %v528_v18 = vunpack.c.l.bf16 %v508_v16  ;;  %v553_v30 = vunpack.c.l.bf16 %v262_v12 }
 0x4b4   :  { %v1007_v22 = vmul.f32 %v544_v15, %v528_v18 }
 0x4b6   :  { %v574_v23 = vpack.c.bf16 %v1007_v22, %v1005_v19 }
 0x4b7   :  { %v475_v24 = vpop.f32.mrf.mxu2 }
 0x4b8   :  { %v509_v26 = vpack.c.bf16 %v475_v24, %v475_v24  ;;  %v245_v3 = vpop.f32.mrf.mxu1 }
 0x4b9   :  { %v264_v8 = vpack.c.bf16 %v245_v3, %v245_v3  ;;  %v651_v3 = vld [vmem:[%s1078_s3 + $0x18] sm:$0xff] }
 0x4ba   :  { %v529_v27 = vunpack.c.l.bf16 %v509_v26 }
 0x4bb   :  { %v555_v16 = vunpack.c.l.bf16 %v264_v8 }
 0x4bc   :  { %v1011_v29 = vmul.f32 %v545_v25, %v529_v27  ;;  %v260_v27 = vpack.c.bf16 %v235_v58, %v235_v58 }
 0x4bf   :  { %v477_v31 = vpop.f32.mrf.mxu2 }
 0x4c0   :  { %v510_v33 = vpack.c.bf16 %v477_v31, %v477_v31  ;;  %v247_v7 = vpop.f32.mrf.mxu1  ;;  %v554_v31 = vunpack.c.l.bf16 %v263_v13 }
 0x4c1   :  { %v265_v11 = vpack.c.bf16 %v247_v7, %v247_v7 }
 0x4c2   :  { %v530_v35 = vunpack.c.l.bf16 %v510_v33 }
 0x4c3   :  { %v556_v25 = vunpack.c.l.bf16 %v265_v11 }
 0x4c4   :  { %v1013_v37 = vmul.f32 %v546_v34, %v530_v35 }
 0x4c6   :  { %v575_v39 = vpack.c.bf16 %v1013_v37, %v1011_v29 }
 0x4c7   :  { %v480_v40 = vpop.f32.mrf.mxu2 }
 0x4c8   :  { %v511_v42 = vpack.c.bf16 %v480_v40, %v480_v40 }
 0x4ca   :  { %v531_v43 = vunpack.c.l.bf16 %v511_v42 }
 0x4cc   :  { %v1017_v44 = vmul.f32 %v547_v41, %v531_v43  ;;  %v259_v43 = vpack.c.bf16 %v232_v47, %v232_v47  ;;  %v796_v47 = vld [vmem:[%s1077_s2] sm:$0xff] }
 0x4cf   :  { %v482_v46 = vpop.f32.mrf.mxu2 }
 0x4d0   :  { %v512_v48 = vpack.c.bf16 %v482_v46, %v482_v46 }
 0x4d2   :  { %v532_v50 = vunpack.c.l.bf16 %v512_v48 }
 0x4d4   :  { %v1019_v52 = vmul.f32 %v548_v49, %v532_v50 }
 0x4d6   :  { %v576_v53 = vpack.c.bf16 %v1019_v52, %v1017_v44  ;;  %v551_v44 = vunpack.c.l.bf16 %v260_v27  ;;  %v550_v52 = vunpack.c.l.bf16 %v259_v43 }
 0x4d7   :  { %v485_v54 = vpop.f32.mrf.mxu2 }
 0x4d8   :  { %v513_v56 = vpack.c.bf16 %v485_v54, %v485_v54 }
 0x4da   :  { %v533_v59 = vunpack.c.l.bf16 %v513_v56 }
 0x4dc   :  { %v565_v60 = vmul.f32 %v549_v21, %v533_v59 }
 0x4df   :  { %v487_v61 = vpop.f32.mrf.mxu2 }
 0x4e0   :  { %v514_v38 = vpack.c.bf16 %v487_v61, %v487_v61 }
 0x4e2   :  { %v534_v49 = vunpack.c.l.bf16 %v514_v38 }
 0x4e4   :  { %v566_v21 = vmul.f32 %v550_v52, %v534_v49 }
 0x4e6   :  { %v577_v58 = vpack.c.bf16 %v566_v21, %v565_v60 }
 0x4e7   :  { %v490_v63 = vpop.f32.mrf.mxu2 }
 0x4e8   :  { %v515_v33 = vpack.c.bf16 %v490_v63, %v490_v63 }
 0x4ea   :  { %v535_v46 = vunpack.c.l.bf16 %v515_v33 }
 0x4ec   :  { %v567_v54 = vmul.f32 %v551_v44, %v535_v46 }
 0x4ef   :  { %v492_v0 = vpop.f32.mrf.mxu2 }
 0x4f0   :  { %v516_v20 = vpack.c.bf16 %v492_v0, %v492_v0 }
 0x4f2   :  { %v536_v40 = vunpack.c.l.bf16 %v516_v20 }
 0x4f4   :  { %v568_v50 = vmul.f32 %v552_v45, %v536_v40 }
 0x4f6   :  { %v578_v56 = vpack.c.bf16 %v568_v50, %v567_v54 }
 0x4f7   :  { %v495_v1 = vpop.f32.mrf.mxu2 }
 0x4f8   :  { %v517_v15 = vpack.c.bf16 %v495_v1, %v495_v1 }
 0x4fa   :  { %v537_v34 = vunpack.c.l.bf16 %v517_v15 }
 0x4fc   :  { %v569_v48 = vmul.f32 %v553_v30, %v537_v34 }
 0x4ff   :  { %v497_v2 = vpop.f32.mrf.mxu2 }
 0x500   :  { %v518_v10 = vpack.c.bf16 %v497_v2, %v497_v2 }
 0x502   :  { %v538_v24 = vunpack.c.l.bf16 %v518_v10 }
 0x504   :  { %v570_v41 = vmul.f32 %v554_v31, %v538_v24 }
 0x506   :  { %v579_v51 = vpack.c.bf16 %v570_v41, %v569_v48 }
 0x507   :  { %v500_v6 = vpop.f32.mrf.mxu2 }
 0x508   :  { %v519_v9 = vpack.c.bf16 %v500_v6, %v500_v6 }
 0x50a   :  { %v539_v17 = vunpack.c.l.bf16 %v519_v9  ;;  %v650_v9 = vld [vmem:[%s1078_s3 + $0x10] sm:$0xff] }
 0x50c   :  { %v571_v35 = vmul.f32 %v555_v16, %v539_v17 }
 0x50f   :  { %v502_v14 = vpop.f32.mrf.mxu2 }
 0x510   :  { %v520_v18 = vpack.c.bf16 %v502_v14, %v502_v14 }
 0x512   :  { %v540_v26 = vunpack.c.l.bf16 %v520_v18 }
 0x514   :  { %v572_v36 = vmul.f32 %v556_v25, %v540_v26 }
 0x516   :  { %v580_v42 = vpack.c.bf16 %v572_v36, %v571_v35 }
 0x518   :  { %593 = vmatpush.bf16.msrb.mxu3 %v580_v42 }
 0x51c   :  { %594 = vmatpush.bf16.msrb.mxu3 %v579_v51 }
 0x520   :  { %595 = vmatpush.bf16.msrb.mxu3 %v578_v56 }
 0x524   :  { %596 = vmatpush.bf16.msrb.mxu3 %v577_v58 }
 0x528   :  { %597 = vmatpush.bf16.msrb.mxu3 %v576_v53  ;;  %v797_v53 = vld [vmem:[%s1077_s2 + $0x8] sm:$0xff] }
 0x52c   :  { %598 = vmatpush.bf16.msrb.mxu3 %v575_v39 }
 0x530   :  { %599 = vmatpush.bf16.msrb.mxu3 %v574_v23 }
 0x534   :  { %600 = vmatpush.bf16.msrb.mxu3 %v573_v5 }
 0x537   :  { %601 = vmatmul.bf16.vlgmr.msrb.gmra.mxu3 %v796_v47 }
 0x547   :  { %606 = vmatmul.bf16.gmra.mxu3 %v797_v53 }
 0x5ba   :  { %v602_v29 = vpop.f32.mrf.mxu3 }
 0x5bb   :  { %612 = vrot.lane.b32.xlu0 %v602_v29, %s817_s6 }
 0x5c2   :  { %v604_v37 = vpop.f32.mrf.mxu3 }
 0x5c3   :  { %614 = vrot.lane.b32.xlu1 %v604_v37, %s817_s6 }
 0x5ca   :  { %v607_v19 = vpop.f32.mrf.mxu3 }
 0x5cb   :  { %616 = vrot.lane.b32.xlu2 %v607_v19, %s817_s6 }
 0x5d2   :  { %v609_v22 = vpop.f32.mrf.mxu3 }
 0x5d3   :  { %618 = vrot.lane.b32.xlu0 %v609_v22, %s817_s6 }
 0x625   :  { %v617_v4 = vpop.permute.xlu2 %616 }
 0x626   :  { %v622_v32 = vadd.f32 %v617_v4, %v607_v19 }
 0x628   :  { %628 = vrot.lane.b32.xlu0 %v622_v32, %s818_s7 }
 0x62d   :  { %v613_v5 = vpop.permute.xlu0 %612 }
 0x62e   :  { %v620_v23 = vadd.f32 %v613_v5, %v602_v29 }
 0x630   :  { %624 = vrot.lane.b32.xlu1 %v620_v23, %s818_s7 }
 0x635   :  { %v615_v39 = vpop.permute.xlu1 %614 }
 0x636   :  { %v621_v59 = vadd.f32 %v615_v39, %v604_v37 }
 0x638   :  { %626 = vrot.lane.b32.xlu2 %v621_v59, %s818_s7 }
 0x645   :  { %v619_v60 = vpop.permute.xlu0 %618 }
 0x646   :  { %v623_v61 = vadd.f32 %v619_v60, %v609_v22 }
 0x648   :  { %630 = vrot.lane.b32.xlu1 %v623_v61, %s818_s7 }
 0x650   :  { %659 = vperm.xlu1 %809, %v649_v62  }
 0x692   :  { %v627_v63 = vpop.permute.xlu2 %626 }
 0x693   :  { %v633_v55 = vadd.f32 %v627_v63, %v621_v59 }
 0x695   :  { %638 = vrot.lane.b32.xlu0 %v633_v55, %s819_s8 }
 0x69a   :  { %v629_v0 = vpop.permute.xlu0 %628 }
 0x69b   :  { %v634_v1 = vadd.f32 %v629_v0, %v622_v32 }
 0x69d   :  { %654 = vperm.xlu0 %808, %v648_v57   ;;  %640 = vrot.lane.b32.xlu1 %v634_v1, %s819_s8 }
 0x6a2   :  { %v625_v2 = vpop.permute.xlu1 %624 }
 0x6a3   :  { %v632_v6 = vadd.f32 %v625_v2, %v620_v23 }
 0x6a5   :  { %636 = vrot.lane.b32.xlu2 %v632_v6, %s819_s8  ;;  %669 = vperm.xlu1 %809, %v651_v3  }
 0x6ba   :  { %v631_v7 = vpop.permute.xlu1 %630 }
 0x6bb   :  { %v635_v8 = vadd.f32 %v631_v7, %v623_v61 }
 0x6bd   :  { %642 = vrot.lane.b32.xlu2 %v635_v8, %s819_s8 }
 0x6c2   :  { %v660_v10 = vpop.permute.xlu1 %659 }
 0x6c5   :  { %664 = vperm.xlu2 %810, %v650_v9  }
 0x6ff   :  { %v637_v14 = vpop.permute.xlu2 %636 }
 0x700   :  { %v644_v15 = vadd.f32 %v637_v14, %v632_v6 }
 0x707   :  { %v639_v11 = vpop.permute.xlu0 %638 }
 0x708   :  { %v645_v12 = vadd.f32 %v639_v11, %v633_v55 }
 0x70a   :  { %v673_v13 = vadd.f32 %v660_v10, %v645_v12 }
 0x70c   :  { %680 = vst [vmem:[%s1076_s4 + $0x10] sm:$0xff] %v673_v13 }
 0x70f   :  { %v641_v16 = vpop.permute.xlu1 %640  ;;  %v655_v17 = vpop.permute.xlu0 %654 }
 0x710   :  { %v672_v18 = vadd.f32 %v655_v17, %v644_v15  ;;  %v646_v27 = vadd.f32 %v641_v16, %v634_v1 }
 0x712   :  { %679 = vst [vmem:[%s1076_s4 + $0x8] sm:$0xff] %v672_v18 }
 0x717   :  { %v643_v20 = vpop.permute.xlu2 %642  ;;  %v670_v25 = vpop.permute.xlu1 %669 }
 0x718   :  { %v647_v24 = vadd.f32 %v643_v20, %v635_v8 }
 0x71a   :  { %v675_v26 = vadd.f32 %v670_v25, %v647_v24 }
 0x71c   :  { %682 = vst [vmem:[%s1076_s4 + $0x20] sm:$0xff] %v675_v26 }
 0x71f   :  { %v665_v28 = vpop.permute.xlu2 %664 }
 0x720   :  { %v674_v30 = vadd.f32 %v665_v28, %v646_v27 }
 0x722   :  { %681 = vst [vmem:[%s1076_s4 + $0x18] sm:$0xff] %v674_v30 }

</bundles_post_ra>
